<compile_context>
chip_gen: v6e
topology: v6e:2x2x1
jax: 0.10.0
libtpu: 0.0.40
codegen_flags: <defaults>
</compile_context>

<pallas_src>
import functools

import jax
import jax.numpy as jnp
from jax import lax
from jax.experimental import pallas as pl
from jax.experimental.pallas import tpu as pltpu

Q = 0.7
K = 0.5
TRAINSET_SIZE = 50000


def _pick_tile_n(n, c, itemsize):
    """Batch tile: ~10 MiB of logits per block, dtype-aware sublane multiple."""
    sublane = max(8, 32 // itemsize)       # 8 for f32, 16 for bf16, 32 for int8
    if n <= sublane:
        return n                           # single block == full (tiny) batch dim
    budget = 10 * 1024 * 1024              # double-buffered -> ~20 MiB of VMEM
    t = budget // max(1, c * itemsize)
    t = max(sublane, (t // sublane) * sublane)
    # Largest sublane multiple <= n so the block is never taller than the array.
    t = min(t, (n // sublane) * sublane)
    return t


def truncated_loss_kernel(logits_ref, tw_ref, out_ref, *, n_total, tile_n, q, k):
    i = pl.program_id(0)

    x = logits_ref[...].astype(jnp.float32)              # [tile_n, C]
    tn, c = x.shape

    # log-sum-exp over the class (lane) axis; full softmax never materialized.
    m = jnp.max(x, axis=1, keepdims=True)                 # [tile_n, 1]
    s = jnp.sum(jnp.exp(x - m), axis=1, keepdims=True)    # [tile_n, 1]

    tw = tw_ref[...]                                      # [tile_n, 2] f32
    tgt = tw[:, 0:1].astype(jnp.int32)                    # exact for class ids
    w = tw[:, 1:2]                                        # gathered weights

    # Pick out the target logit with a single select (no one-hot mul/cast).
    col = lax.broadcasted_iota(jnp.int32, (tn, c), 1)
    x_t = jnp.sum(jnp.where(col == tgt, x, 0.0), axis=1, keepdims=True)

    # Yg ** q = exp(q * (x_t - m - log s))   (exact, no full-tile divide)
    yg_q = jnp.exp(q * (x_t - m - jnp.log(s)))            # [tile_n, 1]

    lqk = (1.0 - k ** q) / q                              # python scalar
    loss = ((1.0 - yg_q) / q - lqk) * w                   # fold lq*w - lqk*w

    # Drop rows past N (partial last block).  jnp.where is a select, so NaN/Inf
    # from unspecified rows cannot leak into the sum.
    row = lax.broadcasted_iota(jnp.int32, (tn, 1), 0)
    valid = (i * tile_n + row) < n_total
    partial = jnp.sum(jnp.where(valid, loss, 0.0))

    # Distinct (8,128) output block per tile -> grid axis can be "parallel"
    # (megacore-shardable on v7x).  Partial sum in [0,0], zeros elsewhere.
    r8 = lax.broadcasted_iota(jnp.int32, (8, 128), 0)
    c128 = lax.broadcasted_iota(jnp.int32, (8, 128), 1)
    out_ref[...] = jnp.where((r8 == 0) & (c128 == 0), partial, 0.0)


def truncated_loss(logits, targets, indexes, weight, q=Q, k=K, tile_n=None):
    """Forward pass of TruncatedLoss. Returns a scalar float32 loss."""
    n, c = logits.shape

    # Parameter gather weight[indexes] is plain-JAX glue (indexing into the
    # frozen parameter table), not kernel compute.
    w = weight[indexes].reshape(n, 1).astype(jnp.float32)
    # Pack targets + gathered weights into one (N, 2) side input so each grid
    # step issues one narrow DMA instead of two.
    tw = jnp.concatenate(
        [targets.reshape(n, 1).astype(jnp.float32), w], axis=1)

    if tile_n is None:
        tile_n = _pick_tile_n(n, c, logits.dtype.itemsize)
    num_tiles = -(-n // tile_n)                           # ceil-div, no padding

    kernel = functools.partial(
        truncated_loss_kernel, n_total=n, tile_n=tile_n, q=q, k=k)

    cost = pl.CostEstimate(
        flops=int(6 * n * c),
        transcendentals=int(n * c + 2 * n),
        bytes_accessed=int(n * c * logits.dtype.itemsize
                           + n * 2 * 4 + num_tiles * 8 * 128 * 4),
    )

    partials = pl.pallas_call(
        kernel,
        out_shape=jax.ShapeDtypeStruct((num_tiles * 8, 128), jnp.float32),
        grid_spec=pltpu.PrefetchScalarGridSpec(
            num_scalar_prefetch=0,
            grid=(num_tiles,),
            in_specs=[
                pl.BlockSpec((tile_n, c), lambda i: (i, 0)),  # logits, native dtype
                pl.BlockSpec((tile_n, 2), lambda i: (i, 0)),  # packed targets+weights
            ],
            out_specs=pl.BlockSpec((8, 128), lambda i: (i, 0)),
        ),
        compiler_params=pltpu.CompilerParams(
            dimension_semantics=("parallel",),
            vmem_limit_bytes=32 * 1024 * 1024),
        cost_estimate=cost,
    )(logits, tw)

    # Finalize: sum of per-tile partials (everything but [k*8, 0] is zero) / N.
    return jnp.sum(partials) * (1.0 / n)


if __name__ == "__main__":
    key = jax.random.PRNGKey(0)
    N, C = 20, 32   # N deliberately not tile-aligned -> exercises partial block
    k1, k2, k3 = jax.random.split(key, 3)

    logits = jax.random.normal(k1, (N, C), dtype=jnp.float32)
    targets = jax.random.randint(k2, (N,), 0, C, dtype=jnp.int32)
    indexes = jax.random.randint(k3, (N,), 0, TRAINSET_SIZE, dtype=jnp.int32)

    # deterministic parameter init (module __init__: torch.ones(trainset_size, 1))
    weight = jnp.ones((TRAINSET_SIZE, 1), dtype=jnp.float32)

    # pure-JAX reference
    p = jax.nn.softmax(logits, axis=1)
    yg = jnp.take_along_axis(p, targets[:, None], axis=1)
    wref = weight[indexes]
    ref = jnp.mean((1.0 - yg ** Q) / Q * wref - (1.0 - K ** Q) / Q * wref)

    # 1) auto tile size (un-padded partial block path)
    loss = truncated_loss(logits, targets, indexes, weight)
    jax.block_until_ready(loss)
    assert abs(float(loss) - float(ref)) < 1e-5, (float(loss), float(ref))

    # 2) forced small tile -> multi-step "parallel" grid + partial last block
    loss_tiled = truncated_loss(logits, targets, indexes, weight, tile_n=8)
    jax.block_until_ready(loss_tiled)
    assert abs(float(loss_tiled) - float(ref)) < 1e-5, (float(loss_tiled), float(ref))

    print("KERNEL_OK")
</pallas_src>

<mosaic_0001>
module attributes {stable_mosaic.version = 11 : i64} {
  func.func @truncated_loss_kernel(%arg0: i32, %arg1: memref<16x32xf32, #tpu.memory_space<vmem>>, %arg2: memref<16x2xf32, #tpu.memory_space<vmem>>, %arg3: memref<8x128xf32, #tpu.memory_space<vmem>>) attributes {dimension_semantics = [#tpu.dimension_semantics<parallel>], iteration_bounds = array<i64: 2>, scalar_prefetch = 0 : i64, scratch_operands = 0 : i64, tpu.core_type = #tpu.core_type<tc>, window_params = [{transform_indices = @transform_0, window_bounds = array<i64: 16, 32>}, {transform_indices = @transform_1, window_bounds = array<i64: 16, 2>}, {transform_indices = @transform_2, window_bounds = array<i64: 8, 128>}]} {
    %c0 = arith.constant 0 : index
    %c0_0 = arith.constant 0 : index
    %0 = vector.load %arg1[%c0, %c0_0] : memref<16x32xf32, #tpu.memory_space<vmem>>, vector<16x32xf32>
    %cst = arith.constant dense<0xFF800000> : vector<16xf32>
    %1 = vector.multi_reduction <maximumf>, %0, %cst [1] : vector<16x32xf32> to vector<16xf32>
    %2 = vector.shape_cast %1 : vector<16xf32> to vector<16x1xf32>
    %3 = vector.broadcast %2 : vector<16x1xf32> to vector<16x32xf32>
    %4 = arith.subf %0, %3 : vector<16x32xf32>
    %5 = math.exp %4 : vector<16x32xf32>
    %cst_1 = arith.constant dense<0.000000e+00> : vector<16xf32>
    %6 = vector.multi_reduction <add>, %5, %cst_1 [1] : vector<16x32xf32> to vector<16xf32>
    %7 = vector.shape_cast %6 : vector<16xf32> to vector<16x1xf32>
    %c0_2 = arith.constant 0 : index
    %c0_3 = arith.constant 0 : index
    %8 = vector.load %arg2[%c0_2, %c0_3] : memref<16x2xf32, #tpu.memory_space<vmem>>, vector<16x2xf32>
    %9 = vector.extract_strided_slice %8 {offsets = [0, 0], sizes = [16, 1], strides = [1, 1]} : vector<16x2xf32> to vector<16x1xf32>
    %10 = arith.fptosi %9 : vector<16x1xf32> to vector<16x1xi32>
    %11 = vector.extract_strided_slice %8 {offsets = [0, 1], sizes = [16, 1], strides = [1, 1]} : vector<16x2xf32> to vector<16x1xf32>
    %12 = tpu.iota {dimensions = array<i32: 1>} : vector<16x32xi32>
    %13 = vector.broadcast %10 : vector<16x1xi32> to vector<16x32xi32>
    %14 = arith.cmpi eq, %12, %13 : vector<16x32xi32>
    %cst_4 = arith.constant 0.000000e+00 : f32
    %15 = vector.broadcast %cst_4 : f32 to vector<16x32xf32>
    %16 = arith.select %14, %0, %15 : vector<16x32xi1>, vector<16x32xf32>
    %cst_5 = arith.constant dense<0.000000e+00> : vector<16xf32>
    %17 = vector.multi_reduction <add>, %16, %cst_5 [1] : vector<16x32xf32> to vector<16xf32>
    %18 = vector.shape_cast %17 : vector<16xf32> to vector<16x1xf32>
    %19 = arith.subf %18, %2 : vector<16x1xf32>
    %20 = math.log %7 : vector<16x1xf32>
    %21 = arith.subf %19, %20 : vector<16x1xf32>
    %cst_6 = arith.constant 0.699999988 : f32
    %22 = vector.broadcast %cst_6 : f32 to vector<16x1xf32>
    %23 = arith.mulf %22, %21 : vector<16x1xf32>
    %24 = math.exp %23 : vector<16x1xf32>
    %cst_7 = arith.constant 1.000000e+00 : f32
    %25 = vector.broadcast %cst_7 : f32 to vector<16x1xf32>
    %26 = arith.subf %25, %24 : vector<16x1xf32>
    %cst_8 = arith.constant 0.699999988 : f32
    %27 = vector.broadcast %cst_8 : f32 to vector<16x1xf32>
    %28 = arith.divf %26, %27 : vector<16x1xf32>
    %cst_9 = arith.constant 0.549182534 : f32
    %29 = vector.broadcast %cst_9 : f32 to vector<16x1xf32>
    %30 = arith.subf %28, %29 : vector<16x1xf32>
    %31 = arith.mulf %30, %11 : vector<16x1xf32>
    %32 = tpu.iota {dimensions = array<i32: 0>} : vector<16x1xi32>
    %c16_i32 = arith.constant 16 : i32
    %33 = arith.muli %arg0, %c16_i32 : i32
    %34 = vector.broadcast %33 : i32 to vector<16x1xi32>
    %35 = arith.addi %34, %32 : vector<16x1xi32>
    %c20_i32 = arith.constant 20 : i32
    %36 = vector.broadcast %c20_i32 : i32 to vector<16x1xi32>
    %37 = arith.cmpi slt, %35, %36 : vector<16x1xi32>
    %cst_10 = arith.constant 0.000000e+00 : f32
    %38 = vector.broadcast %cst_10 : f32 to vector<16x1xf32>
    %39 = arith.select %37, %31, %38 : vector<16x1xi1>, vector<16x1xf32>
    %40 = vector.shape_cast %39 : vector<16x1xf32> to vector<1x16x1xf32>
    %cst_11 = arith.constant dense<0.000000e+00> : vector<1xf32>
    %41 = vector.multi_reduction <add>, %40, %cst_11 [1, 2] : vector<1x16x1xf32> to vector<1xf32>
    %42 = vector.shape_cast %41 : vector<1xf32> to vector<1x1x1xf32>
    %43 = vector.extract %42[0, 0, 0] : f32 from vector<1x1x1xf32>
    %44 = tpu.iota {dimensions = array<i32: 0>} : vector<8x128xi32>
    %45 = tpu.iota {dimensions = array<i32: 1>} : vector<8x128xi32>
    %c0_i32 = arith.constant 0 : i32
    %46 = vector.broadcast %c0_i32 : i32 to vector<8x128xi32>
    %47 = arith.cmpi eq, %44, %46 : vector<8x128xi32>
    %c0_i32_12 = arith.constant 0 : i32
    %48 = vector.broadcast %c0_i32_12 : i32 to vector<8x128xi32>
    %49 = arith.cmpi eq, %45, %48 : vector<8x128xi32>
    %50 = arith.andi %47, %49 : vector<8x128xi1>
    %cst_13 = arith.constant 0.000000e+00 : f32
    %51 = vector.broadcast %43 : f32 to vector<8x128xf32>
    %52 = vector.broadcast %cst_13 : f32 to vector<8x128xf32>
    %53 = arith.select %50, %51, %52 : vector<8x128xi1>, vector<8x128xf32>
    %c0_14 = arith.constant 0 : index
    %c0_15 = arith.constant 0 : index
    %54 = vector.load %arg3[%c0_14, %c0_15] : memref<8x128xf32, #tpu.memory_space<vmem>>, vector<8x128xf32>
    tpu.vector_store %arg3[%c0_14, %c0_15], %53 {strides = array<i32>} : memref<8x128xf32, #tpu.memory_space<vmem>>, vector<8x128xf32>,
    return
  }
  func.func @transform_0(%arg0: i32) -> (i32, i32) {
    %c0_i32 = arith.constant 0 : i32
    %c0_i32_0 = arith.constant 0 : i32
    return %arg0, %c0_i32 : i32, i32
  }
  func.func @transform_1(%arg0: i32) -> (i32, i32) {
    %c0_i32 = arith.constant 0 : i32
    %c0_i32_0 = arith.constant 0 : i32
    return %arg0, %c0_i32 : i32, i32
  }
  func.func @transform_2(%arg0: i32) -> (i32, i32) {
    %c0_i32 = arith.constant 0 : i32
    %c0_i32_0 = arith.constant 0 : i32
    return %arg0, %c0_i32 : i32, i32
  }
}

</mosaic_0001>

<bundles_post_ra>
// kernel: tpu_custom_call.1
= control target key start
LH: loop header
LB: loop body
LE: loop exit
PB: predicated region body
PF: predicated region fallthrough
CT: control target
= control target key end

     0   :  { %7 = vsyncpa [#allocation3], 0  ;;  %s667_s0 = inlined_call_operand.vmem [shape: f32[20,32], index: 0, kind: input, shape index: {}]   ;;  %s668_s1 = inlined_call_operand.vmem [shape: f32[20,2], index: 1, kind: input, shape index: {}]   ;;  %s669_s2 = inlined_call_operand.hbm [shape: f32[16,128], index: 2, kind: output, shape index: {}]  }
   0x1   :  { %9 = vsyncpa [#allocation3 + $0x1], 0  ;;  %s552_s9 = smov 0   ;;  %s554_s10 = smov 0  }
   0x2   :  { %s556_s11 = smov 0   ;;  %s558_s12 = smov 0  }
   0x3 LB: > { %s573_s13 = sadd.s32 4294967295, %s532_s12   ;;  %s395_s14 = sadd.s32 4294967294, %s532_s12   ;;  %s532_s12 = sphi %s558_s12, %s675_s12   ;;  %s528_s11 = sphi %s556_s11, %s674_s11   ;;  %s524_s10 = sphi %s554_s10, %s673_s10   ;;  %s520_s9 = sphi %s552_s9, %s672_s9  }
   0x4   : > { %s577_s15 = sadd.s32 1, %s532_s12   ;;  %s74_s16 = sadd.s32 1, %s528_s11 }
   0x5   : > { %s71_s17 = ssub.s32 %s532_s12, %s577_s15  ;;  %p84_p0 = scmp.ne.s32.totalorder %s528_s11, %s524_s10 }
   0x6   : > { %p72_p1 = scmp.eq.s32.totalorder %s71_s17, 0  ;;  %p85_p2 = scmp.eq.s32.totalorder %s573_s13, 1 }
   0x7   : > { %p90_p3 = scmp.ne.s32.totalorder %s524_s10, %s520_s9  ;;  %p91_p4 = scmp.eq.s32.totalorder %s395_s14, 1 }
   0x8   : > { %s588_s18 = scalar_select %p72_p1, %s528_s11, %s74_s16  }
   0x9   : > { %p590_p5 = por %p85_p2, %p84_p0  ;;  %p594_p6 = por %p91_p4, %p90_p3 }
   0xa   : > { %p398_p7 = scmp.ge.s32.totalorder %s532_s12, 1  ;;  %p143_p8 = scmp.lt.s32.totalorder %s532_s12, 3 }
   0xc   : > { %p144_p9 = pnand %p398_p7, %p143_p8 }
   0xd   : > { %s400_s21 = sshll.u32 (!%p144_p9), %s573_s13, 1  ;;  %s406_s29 = sshll.u32 (!%p144_p9), %s573_s13, 4 }
   0xe   : > { %147 = sbr.rel (%p144_p9) target bundleno = 701 (0x2bd), region = 28  ;;  %p183_p10 = scmp.lt.s32.totalorder (!%p144_p9), %s400_s21, 2 }
   0xf   : > { %s535_s30 = smov (!%p144_p9), 127   ;;  %s175_s3 = sand.u32 (!%p144_p9), 1, %s524_s10  }
  0x10   : > { %s399_s4 = sshll.u32 (!%p144_p9), %s175_s3, 3  ;;  %s408_s5 = sshll.u32 (!%p144_p9), %s573_s13, 7 }
  0x11   : > { %s177_s6 = scalar_lea.vmem (!%p144_p9), [#allocation2], %s399_s4  ;;  %s632_s17 = scalar_lea.hbm (!%p144_p9), %s669_s2, %s408_s5 }
  0x12   : > { %s324_s7 = sshll.u32 (!%p144_p9), %s177_s6, 4  ;;  %s536_s13 = smov (!%p144_p9), [#allocation2]   ;;  %s325_s7 = int_to_ptr.vmem [resolvable:$true] %s324_s7 }
  0x13   : > { %v534_v0 = vmov 0   ;;  %s677_s21 = smov (!%p183_p10, %s400_s21), 2  ;;  %vm208_vm0 = vcmask 261120   ;;  %v231_v17 = vlaneseq  ;;  %v276_v46 = vstv %s406_s29  ;;  %s476_s23 = sshll.u32 %s536_s13, 4  ;;  %s477_s23 = int_to_ptr.vmem [resolvable:$false] %s476_s23 }
  0x14   : > { %458 = vset.pattern.permute.xlu1 %v534_v0  ;;  %459 = vset.pattern.permute.xlu0 %v534_v0  ;;  %s401_s22 = sshll.u32 %s677_s21, 3  ;;  %vm291_vm5 = vcmask 7168   ;;  %s311_s21 = scalar_lea.sflag [#allocation3], %s175_s3 }
  0x15   : > { %s186_s25 = scalar_lea.vmem %s667_s0, %s401_s22  ;;  %s200_s28 = scalar_lea.vmem %s668_s1, %s401_s22  ;;  %v615_v19 = vand.u32 127, %v231_v17  ;;  %v273_v45 = vshrl.u32 %v231_v17, 7 }
  0x16   : > { %v206_v1 = vld [vmem:[%s186_s25] sm:$0xff]  ;;  %v207_v2 = vld [vmem:[%s186_s25 + $0x8] sm:$0xff]  ;;  %s472_s22 = scalar_lea.vmem %s325_s7, 128  ;;  %s478_s24 = scalar_lea.vmem %s477_s23, 256 }
  0x17   : > { %v607_v3 = vld [vmem:[%s200_s28] sm:$0xff]  ;;  %v209_v4 = vsel %vm208_vm0, %v206_v1, -inf  ;;  %v610_v5 = vld [vmem:[%s200_s28 + $0x8] sm:$0xff]  ;;  %v212_v8 = vsel %vm208_vm0, %v207_v2, -inf  ;;  %v277_v49 = vadd.s32 %v276_v46, %v273_v45  ;;  %v274_v50 = vadd.s32 8, %v273_v45  ;;  %p473_p11 = scmp.ne.s32.totalorder %s325_s7, %s472_s22  ;;  %p479_p0 = scmp.lt.s32.totalorder %s325_s7, %s477_s23 }
  0x18   : > { %v411_v6 = vtrunc.f32 %v607_v3  ;;  %210 = vmax.xlane.f32.xlu0 %v209_v4  ;;  %v413_v7 = vtrunc.f32 %v610_v5  ;;  %vm304_vm6 = vcmp.eq.s32.totalorder %v273_v45, 0  ;;  %vm305_vm7 = vcmp.eq.s32.totalorder %v615_v19, 0  ;;  %p480_p1 = scmp.lt.s32.totalorder %s478_s24, %s472_s22 }
  0x19   : > { %vm279_vm3 = vcmp.lt.s32.totalorder %v277_v49, 20  ;;  %v278_v55 = vadd.s32 %v276_v46, %v274_v50  ;;  %vm306_vm8 = vmand %vm304_vm6, %vm305_vm7  ;;  %p474_p12 = pnand %p473_p11, %p590_p5 }
  0x1a   : > { %v412_v9 = vcvt.f32.s32 %v411_v6  ;;  %v414_v10 = vcvt.f32.s32 %v413_v7  ;;  %p481_p2 = por %p480_p1, %p479_p0 }
  0x1b   : > { %vm280_vm4 = vcmp.lt.s32.totalorder %v278_v55, 20  ;;  %p475_p13 = pneg %p474_p12 }
  0x1c   : > { %234 = vperm.xlu1 %458, %v412_v9   ;;  %213 = vmax.xlane.f32.xlu0 %v212_v8 }
  0x1d   : > { %p482_p3 = pnand %p481_p2, %p475_p13 }
  0x20   : > { %237 = vperm.xlu1 %458, %v414_v10  }
  0x97   : > { %v235_v18 = vpop.permute.xlu1 %234 }
  0x98   : > { %vm239_vm1 = vcmp.eq.s32.totalorder %v615_v19, %v235_v18 }
  0x99   : > { %v241_v22 = vsel %vm239_vm1, %v206_v1, 0.0 }
  0x9a   : > { %v243_v24 = vsel %vm208_vm0, %v241_v22, 0.0 }
  0x9b   : > { %v238_v20 = vpop.permute.xlu1 %237 }
  0x9c   : > { %vm240_vm2 = vcmp.eq.s32.totalorder %v615_v19, %v238_v20 }
  0x9d   : > { %v242_v26 = vsel %vm240_vm2, %v207_v2, 0.0 }
  0x9e   : > { %v246_v28 = vsel %vm208_vm0, %v242_v26, 0.0 }
  0xa1   : > { %v211_v11 = vpop.xlane.xlu0 %210 }
  0xa2   : > { %v215_v12 = vsub.f32 %v206_v1, %v211_v11 }
  0xa4   : > { %v217_v13 = vmul.f32 1.442695, %v215_v12 }
  0xa5   : > { %v214_v14 = vpop.xlane.xlu0 %213 }
  0xa6   : > { %460 = vpow2.f32 %v217_v13  ;;  %v216_v15 = vsub.f32 %v207_v2, %v214_v14 }
  0xa8   : > { %v219_v16 = vmul.f32 1.442695, %v216_v15 }
  0xaa   : > { %462 = vpow2.f32 %v219_v16 }
  0xb3   : > { %v461_v21 = vpop.eup %460 }
  0xb4   : > { %v221_v23 = vsel %vm208_vm0, %v461_v21, 0.0 }
  0xb5   : > { %222 = vadd.xlane.f32.xlu0 %v221_v23 }
  0xb7   : > { %v463_v25 = vpop.eup %462 }
  0xb8   : > { %v224_v27 = vsel %vm208_vm0, %v463_v25, 0.0 }
  0xb9   : > { %244 = vadd.xlane.f32.xlu0 %v243_v24  ;;  %225 = vadd.xlane.f32.xlu1 %v224_v27 }
  0xbd   : > { %247 = vadd.xlane.f32.xlu0 %v246_v28 }
 0x13e   : > { %v223_v29 = vpop.xlane.xlu0 %222 }
 0x13f   : > { %464 = vlog2.f32 %v223_v29 }
 0x142   : > { %v226_v30 = vpop.xlane.xlu1 %225  ;;  %v245_v31 = vpop.xlane.xlu0 %244 }
 0x143   : > { %466 = vlog2.f32 %v226_v30  ;;  %v249_v34 = vsub.f32 %v245_v31, %v211_v11 }
 0x146   : > { %v248_v35 = vpop.xlane.xlu0 %247 }
 0x147   : > { %v250_v40 = vsub.f32 %v248_v35, %v214_v14 }
 0x14c   : > { %v465_v32 = vpop.eup %464 }
 0x14d   : > { %v252_v33 = vmul.f32 0.6931472, %v465_v32 }
 0x14f   : > { %v255_v36 = vsub.f32 %v249_v34, %v252_v33 }
 0x150   : > { %v467_v37 = vpop.eup %466 }
 0x151   : > { %v254_v38 = vmul.f32 0.6931472, %v467_v37  ;;  %v257_v39 = vmul.f32 0.7, %v255_v36 }
 0x153   : > { %v259_v41 = vmul.f32 1.442695, %v257_v39  ;;  %v256_v42 = vsub.f32 %v250_v40, %v254_v38 }
 0x155   : > { %468 = vpow2.f32 %v259_v41  ;;  %v258_v43 = vmul.f32 0.7, %v256_v42 }
 0x157   : > { %v261_v44 = vmul.f32 1.442695, %v258_v43 }
 0x159   : > { %470 = vpow2.f32 %v261_v44 }
 0x162   : > { %v469_v47 = vpop.eup %468 }
 0x163   : > { %v263_v48 = vsub.f32 1.0, %v469_v47 }
 0x165   : > { %v266_v51 = vmul.f32 1.4285715, %v263_v48 }
 0x166   : > { %v471_v52 = vpop.eup %470 }
 0x167   : > { %v404_v53 = vadd.f32 -0.54918253, %v266_v51  ;;  %v264_v54 = vsub.f32 1.0, %v471_v52 }
 0x169   : > { %v270_v56 = vmul.f32 %v404_v53, %v607_v3  ;;  %v267_v57 = vmul.f32 1.4285715, %v264_v54 }
 0x16b   : > { %v281_v58 = vsel %vm279_vm3, %v270_v56, 0.0  ;;  %v405_v59 = vadd.f32 -0.54918253, %v267_v57 }
 0x16c   : > { %285 = vrot.lane.b32.xlu0 %v281_v58, %s535_s30 }
 0x16d   : > { %v271_v60 = vmul.f32 %v405_v59, %v610_v5 }
 0x16f   : > { %v282_v61 = vsel %vm280_vm4, %v271_v60, 0.0 }
 0x170   : > { %287 = vrot.lane.b32.xlu0 %v282_v61, %s535_s30 }
 0x1de   : > { %v286_v62 = vpop.permute.xlu0 %285 }
 0x1df   : > { %v292_v0 = vsel %vm291_vm5, %v286_v62, 0.0 }
 0x1e2   : > { %v288_v63 = vpop.permute.xlu0 %287 }
 0x1e3   : > { %v293_v1 = vsel %vm291_vm5, %v288_v63, 0.0 }
 0x1e4   : > { %v294_v2 = vadd.f32 %v293_v1, %v292_v0 }
 0x1e6   : > { %295 = vadd.xlane.f32.xlu1 %v294_v2 }
 0x26f   : > { %v296_v3 = vpop.xlane.xlu1 %295 }
 0x270   : > { %v297_v4 = vrot.slane %v296_v3, 4 }
 0x272   : > { %v298_v6 = vadd.f32 %v297_v4, %v296_v3 }
 0x274   : > { %v299_v7 = vrot.slane %v298_v6, 2 }
 0x276   : > { %v300_v8 = vadd.f32 %v299_v7, %v298_v6 }
 0x278   : > { %v301_v9 = vrot.slane %v300_v8, 1 }
 0x27a   : > { %v302_v10 = vadd.f32 %v301_v9, %v300_v8 }
 0x27c   : > { %415 = vpush %v302_v10 }
 0x2ad   : > { %s416_s8 = spop %415 }
 0x2ae   : > { %v307_v5 = vstv %s416_s8 }
 0x2af   : > { %v308_v11 = vsel %vm306_vm8, %v307_v5, 0.0 }
 0x2b0   : > { %309 = vst [vmem:[%s177_s6] sm:$0xff] %v308_v11 }
 0x2b1   : > { %485 = shalt.err (!%p482_p3)
}
 0x2b2   : > { %s486_s25 = scalar_lea.hbm %s632_s17, 128  ;;  %s490_s28 = scalar_lea.hbm %s669_s2, 256 }
 0x2b3   : > { %p487_p4 = scmp.ne.s32.totalorder %s632_s17, %s486_s25  ;;  %p491_p9 = scmp.lt.s32.totalorder %s632_s17, %s669_s2 }
 0x2b4   : > { %p492_p10 = scmp.lt.s32.totalorder %s490_s28, %s486_s25 }
 0x2b5   : > { %p488_p7 = pnand %p487_p4, %p590_p5 }
 0x2b6   : > { %p493_p11 = por %p492_p10, %p491_p9 }
 0x2b7   : > { %p489_p8 = pneg %p488_p7 }
 0x2b9   : > { %p494_p12 = pnand %p493_p11, %p489_p8 }
 0x2bb   : > { %497 = shalt.err (!%p494_p12)
}
 0x2bc   : > { %417 = dma.vmem_to_hbm [thread:$0]  (%p590_p5), %s325_s7, 128, %s632_s17, %s311_s21  }
 0x2bd PF: > { %p423_p13 = scmp.ge.s32.totalorder %s532_s12, 2  ;;  %s336_s3 = sand.u32 1, %s520_s9  }
 0x2be   : > { %s337_s4 = scalar_lea.sflag [#allocation3], %s336_s3 }
 0x2bf   : > { %p420_p0 = pnand %p423_p13, %p594_p6 }
 0x2c1   : > { %p421_p1 = pneg %p420_p0 }
 0x2c3   : > { %515 = dma.done.wait (%p421_p1), %s337_s4, 128  }
 0x2c4   : > { %517 = vsyncadd (%p421_p1), %s337_s4, 4294967168  ;;  %p12_p2 = scmp.ge.s32.totalorder %s577_s15, 4   ;;  %s672_s9 = smov %s524_s10 }
 0x2c5   : > { %s673_s10 = smov %s528_s11  ;;  %s674_s11 = smov %s588_s18 }
 0x2c6   : > { %s675_s12 = smov %s577_s15  ;;  %14 = sbr.rel (!%p12_p2) target bundleno = 3 (0x3), region = 66 }
 0x2cb   :  { %342 = vsyncpa [#allocation3], 1 }
 0x2cc   :  { %344 = vsyncpa [#allocation3 + $0x1], 1 }

</bundles_post_ra>
